<compile_context>
chip_gen: v5e
topology: v5e:2x2
jax: 0.10.0
libtpu: 0.0.40
codegen_flags: <defaults>
</compile_context>

<pallas_src>
import math
import functools

import jax
import jax.numpy as jnp
from jax.experimental import pallas as pl
from jax.experimental.pallas import tpu as pltpu


def _round_up(x, m):
    return (x + m - 1) // m * m


def _pick_tile(total, target, quantum=128):
    """Largest multiple of `quantum` <= target that divides `total`.
    `total` must be a multiple of `quantum` (so this always terminates)."""
    if total <= target:
        return total
    t = max((target // quantum) * quantum, quantum)
    while total % t != 0:
        t -= quantum
    return t


# ----------------------------- kernels ------------------------------------


def _linear_kernel_single_k(x_ref, w_ref, b_ref, o_ref):
    # x_ref: (tb, K)  w_ref: (K, tn)  b_ref: (1, tn)  o_ref: (tb, tn)
    acc = jax.lax.dot_general(
        x_ref[...], w_ref[...],
        dimension_numbers=(((1,), (0,)), ((), ())),
        preferred_element_type=jnp.float32,
    )
    o_ref[...] = (acc + b_ref[...]).astype(o_ref.dtype)


def _linear_kernel_multi_k(x_ref, w_ref, b_ref, o_ref):
    # Output block is revisited across k (same (i, j) index) => resident in
    # VMEM; accumulate directly into it (f32), bias written at k == 0.
    k = pl.program_id(2)

    @pl.when(k == 0)
    def _():
        o_ref[...] = jnp.broadcast_to(b_ref[...], o_ref.shape).astype(o_ref.dtype)

    o_ref[...] += jax.lax.dot_general(
        x_ref[...], w_ref[...],
        dimension_numbers=(((1,), (0,)), ((), ())),
        preferred_element_type=jnp.float32,
    )


# ----------------------------- wrapper -------------------------------------


def prepare_simple_linear_params(weight, bias, compute_dtype=jnp.bfloat16):
    """One-time weight transpose + pad (PyTorch (OUT, IN) -> padded (IN, OUT)).

    Call once at parameter setup; the result is reused by every forward call
    so no HBM transpose/pad traffic is paid per step.
    """
    OUT, IN = weight.shape
    IN_pad = _round_up(IN, 128)
    OUT_pad = _round_up(OUT, 128)
    w_p = jnp.pad(weight.T, ((0, IN_pad - IN), (0, OUT_pad - OUT))).astype(compute_dtype)
    if bias is None:
        bias = jnp.zeros((OUT,), jnp.float32)
    b_p = jnp.pad(bias.astype(jnp.float32), (0, OUT_pad - OUT)).reshape(1, OUT_pad)
    return w_p, b_p


@functools.partial(
    jax.jit,
    static_argnames=("out_features", "block_b", "block_n", "block_k",
                     "max_single_block_k"),
)
def simple_linear_forward(x, w_p, b_p, *, out_features,
                          block_b=512, block_n=512, block_k=512,
                          max_single_block_k=None):
    """Pallas implementation of SimpleLinear.forward.

    x:   (B, IN)              float32 (cast to w_p.dtype for the MXU)
    w_p: (IN_pad, OUT_pad)    pre-transposed, pre-padded weight (bf16 or f32)
    b_p: (1, OUT_pad)         pre-padded bias, float32
    returns {'logits': (B, out_features) float32}
    """
    B, IN = x.shape
    IN_pad, OUT_pad = w_p.shape
    assert b_p.shape == (1, OUT_pad)
    assert IN <= IN_pad and out_features <= OUT_pad

    compute_dtype = w_p.dtype
    itemsize = jnp.dtype(compute_dtype).itemsize
    if max_single_block_k is None:
        # Collapse the K grid whenever the full-K tiles comfortably fit VMEM.
        max_single_block_k = 4096 if itemsize <= 2 else 2048

    # ---- tile selection (8 / 128 aligned, tiles divide the padded shapes) --
    tb = min(block_b, _round_up(B, 8))
    B_pad = _round_up(B, tb)
    tn = _pick_tile(OUT_pad, block_n)
    if IN_pad <= max_single_block_k:
        tk = IN_pad                       # single-K path
    else:
        tk = _pick_tile(IN_pad, block_k)  # multi-K path

    # Guarantee >=2 blocks on a "parallel" axis so both v7x TCs get work.
    if B_pad // tb == 1 and OUT_pad // tn == 1:
        if tn >= 256 and tn % 256 == 0:
            tn //= 2
        elif tb >= 16 and tb % 16 == 0:
            tb //= 2

    # ---- pad/cast the activation only (weight/bias are already prepared) ---
    x_p = jnp.pad(x, ((0, B_pad - B), (0, IN_pad - IN))).astype(compute_dtype)

    # ---- VMEM budget, capped to the chip --------------------------------
    tile_bytes = (2 * (tb * tk + tk * tn) * itemsize   # double-buffered x, w
                  + 2 * tn * 4                         # bias (f32)
                  + 2 * tb * tn * 4)                   # f32 output blocks
    try:
        vmem_cap = int(getattr(pltpu.get_tpu_info(), "vmem_capacity_bytes",
                               64 << 20))
    except Exception:
        vmem_cap = 64 << 20
    ceiling = min(100 << 20, vmem_cap * 3 // 4)
    vmem_limit = int(min(max(tile_bytes + (8 << 20), 32 << 20), ceiling))

    cost = pl.CostEstimate(
        flops=2 * B_pad * IN_pad * OUT_pad,
        bytes_accessed=(B_pad * IN_pad * itemsize + IN_pad * OUT_pad * itemsize
                        + B_pad * OUT_pad * 4 + OUT_pad * 4),
        transcendentals=0,
    )

    if IN_pad // tk == 1:
        grid = (B_pad // tb, OUT_pad // tn)
        in_specs = [
            pl.BlockSpec((tb, tk), lambda i, j: (i, 0)),   # x tile
            pl.BlockSpec((tk, tn), lambda i, j: (0, j)),   # w (IN, OUT) tile
            pl.BlockSpec((1, tn), lambda i, j: (0, j)),    # bias tile
        ]
        out_specs = pl.BlockSpec((tb, tn), lambda i, j: (i, j))
        kernel = _linear_kernel_single_k
        dims = ("parallel", "parallel")
    else:
        grid = (B_pad // tb, OUT_pad // tn, IN_pad // tk)
        in_specs = [
            pl.BlockSpec((tb, tk), lambda i, j, k: (i, k)),
            pl.BlockSpec((tk, tn), lambda i, j, k: (k, j)),
            pl.BlockSpec((1, tn), lambda i, j, k: (0, j)),
        ]
        out_specs = pl.BlockSpec((tb, tn), lambda i, j, k: (i, j))
        kernel = _linear_kernel_multi_k
        dims = ("parallel", "parallel", "arbitrary")

    out_padded = pl.pallas_call(
        kernel,
        out_shape=jax.ShapeDtypeStruct((B_pad, OUT_pad), jnp.float32),
        grid_spec=pltpu.PrefetchScalarGridSpec(
            num_scalar_prefetch=0,
            grid=grid,
            in_specs=in_specs,
            out_specs=out_specs,
        ),
        compiler_params=pltpu.CompilerParams(
            dimension_semantics=dims,
            vmem_limit_bytes=vmem_limit,
        ),
        cost_estimate=cost,
    )(x_p, w_p, b_p)

    return {"logits": out_padded[:B, :out_features]}


def init_simple_linear_params(key, in_features, out_features):
    """Matches SimpleLinear.reset_parameters():
    kaiming_uniform_(weight, nonlinearity='linear') -> U(+-sqrt(3/fan_in));
    bias = 0.
    """
    bound = math.sqrt(3.0 / in_features)  # gain = 1 for 'linear'
    weight = jax.random.uniform(
        key, (out_features, in_features), dtype=jnp.float32,
        minval=-bound, maxval=bound,
    )
    bias = jnp.zeros((out_features,), dtype=jnp.float32)
    return weight, bias


if __name__ == "__main__":
    key = jax.random.PRNGKey(0)
    k_w, k_x, k_w2, k_x2 = jax.random.split(key, 4)

    # --- Test 1: small shape, f32 compute path, exact vs. reference --------
    in_f, out_f, batch = 32, 16, 8
    weight, bias = init_simple_linear_params(k_w, in_f, out_f)
    x = jax.random.normal(k_x, (batch, in_f), dtype=jnp.float32)
    w_p32, b_p32 = prepare_simple_linear_params(weight, bias,
                                                compute_dtype=jnp.float32)
    out = simple_linear_forward(x, w_p32, b_p32, out_features=out_f)
    logits = jax.block_until_ready(out["logits"])
    ref = x @ weight.T + bias
    assert logits.shape == (batch, out_f)
    assert jnp.allclose(logits, ref, atol=1e-5, rtol=1e-5)

    # --- Test 2: default bf16 compute path, non-tile-aligned shapes --------
    in_f2, out_f2, batch2 = 300, 130, 70
    w2, b2 = init_simple_linear_params(k_w2, in_f2, out_f2)
    x2 = jax.random.normal(k_x2, (batch2, in_f2), dtype=jnp.float32)
    w2_p, b2_p = prepare_simple_linear_params(w2, b2)          # bf16 weights
    out2 = jax.block_until_ready(
        simple_linear_forward(x2, w2_p, b2_p, out_features=out_f2)["logits"])
    ref2 = (x2.astype(jnp.bfloat16).astype(jnp.float32)
            @ w2.T.astype(jnp.bfloat16).astype(jnp.float32)) + b2
    assert out2.shape == (batch2, out_f2)
    assert jnp.allclose(out2, ref2, atol=2e-2, rtol=2e-2)

    # --- Test 3: force the multi-K (resident-output accumulate) path -------
    out3 = jax.block_until_ready(
        simple_linear_forward(x2, w2_p, b2_p, out_features=out_f2,
                              block_k=128, max_single_block_k=128)["logits"])
    assert jnp.allclose(out3, ref2, atol=2e-2, rtol=2e-2)

    print("KERNEL_OK")
</pallas_src>

<mosaic_0001>
module attributes {stable_mosaic.version = 11 : i64} {
  func.func @_linear_kernel_single_k(%arg0: i32, %arg1: i32, %arg2: memref<8x128xf32, #tpu.memory_space<vmem>>, %arg3: memref<128x128xf32, #tpu.memory_space<vmem>>, %arg4: memref<1x128xf32, #tpu.memory_space<vmem>>, %arg5: memref<8x128xf32, #tpu.memory_space<vmem>>) attributes {dimension_semantics = [#tpu.dimension_semantics<parallel>, #tpu.dimension_semantics<parallel>], iteration_bounds = array<i64: 1, 1>, scalar_prefetch = 0 : i64, scratch_operands = 0 : i64, tpu.core_type = #tpu.core_type<tc>, window_params = [{transform_indices = @transform_0, window_bounds = array<i64: 8, 128>}, {transform_indices = @transform_1, window_bounds = array<i64: 128, 128>}, {transform_indices = @transform_2, window_bounds = array<i64: 1, 128>}, {transform_indices = @transform_3, window_bounds = array<i64: 8, 128>}]} {
    %c0 = arith.constant 0 : index
    %c0_0 = arith.constant 0 : index
    %0 = vector.load %arg2[%c0, %c0_0] : memref<8x128xf32, #tpu.memory_space<vmem>>, vector<8x128xf32>
    %c0_1 = arith.constant 0 : index
    %c0_2 = arith.constant 0 : index
    %1 = vector.load %arg3[%c0_1, %c0_2] : memref<128x128xf32, #tpu.memory_space<vmem>>, vector<128x128xf32>
    %cst = arith.constant dense<0.000000e+00> : vector<8x128xf32>
    %2 = tpu.matmul %0, %1, %cst {dimension_numbers = #tpu.dot_dimension_numbers<[1], [0], [0], [1], [0, 0, 1, 1], [], []>} : vector<8x128xf32>, vector<128x128xf32>, vector<8x128xf32> -> vector<8x128xf32>
    %c0_3 = arith.constant 0 : index
    %c0_4 = arith.constant 0 : index
    %3 = vector.load %arg4[%c0_3, %c0_4] : memref<1x128xf32, #tpu.memory_space<vmem>>, vector<1x128xf32>
    %4 = vector.broadcast %3 : vector<1x128xf32> to vector<8x128xf32>
    %5 = arith.addf %2, %4 : vector<8x128xf32>
    %c0_5 = arith.constant 0 : index
    %c0_6 = arith.constant 0 : index
    %6 = vector.load %arg5[%c0_5, %c0_6] : memref<8x128xf32, #tpu.memory_space<vmem>>, vector<8x128xf32>
    tpu.vector_store %arg5[%c0_5, %c0_6], %5 {strides = array<i32>} : memref<8x128xf32, #tpu.memory_space<vmem>>, vector<8x128xf32>,
    return
  }
  func.func @transform_0(%arg0: i32, %arg1: i32) -> (i32, i32) {
    %c0_i32 = arith.constant 0 : i32
    %c0_i32_0 = arith.constant 0 : i32
    return %arg0, %c0_i32 : i32, i32
  }
  func.func @transform_1(%arg0: i32, %arg1: i32) -> (i32, i32) {
    %c0_i32 = arith.constant 0 : i32
    %c0_i32_0 = arith.constant 0 : i32
    return %c0_i32, %arg1 : i32, i32
  }
  func.func @transform_2(%arg0: i32, %arg1: i32) -> (i32, i32) {
    %c0_i32 = arith.constant 0 : i32
    %c0_i32_0 = arith.constant 0 : i32
    return %c0_i32, %arg1 : i32, i32
  }
  func.func @transform_3(%arg0: i32, %arg1: i32) -> (i32, i32) {
    %c0_i32 = arith.constant 0 : i32
    return %arg0, %arg1 : i32, i32
  }
}

</mosaic_0001>

<bundles_post_ra>
// kernel: simple_linear_forward.1
= control target key start
LH: loop header
LB: loop body
LE: loop exit
PB: predicated region body
PF: predicated region fallthrough
CT: control target
= control target key end

     0   :  { %8 = vsyncpa [#allocation3], 0  ;;  %s183_s0 = inlined_call_operand.vmem [shape: f32[8,128], index: 0, kind: input, shape index: {}]   ;;  %s184_s1 = inlined_call_operand.hbm [shape: f32[128,128], index: 1, kind: input, shape index: {}]   ;;  %s185_s2 = inlined_call_operand.vmem [shape: f32[1,128], index: 2, kind: input, shape index: {}]   ;;  %s186_s3 = inlined_call_operand.hbm [shape: f32[8,128], index: 3, kind: output, shape index: {}]  }
   0x1   :  { %9 = vsyncpa [#allocation4], 0  ;;  %s16_s14 = sshll.u32 %s184_s1, 4  ;;  %s147_s15 = smov [#allocation2]   ;;  %s17_s14 = int_to_ptr.hbm [resolvable:$true] %s16_s14 }
   0x2   :  { %s18_s16 = sshll.u32 %s147_s15, 4  ;;  %s148_s17 = smov 128   ;;  %s19_s16 = int_to_ptr.vmem [resolvable:$true] %s18_s16 }
   0x3   :  { %s149_s18 = smov 8  }
   0x4   :  { %24 = dma.hbm_to_vmem [thread:$0]  %s17_s14, 2048, %s19_s16, [#allocation3], %s148_s17, %s148_s17, %s149_s18  }
   0x5   :  { %143 = dma.done.wait [#allocation3], 2048  }
   0x6   :  { %144 = vsyncadd [#allocation3], 4294965248  ;;  %v47_v0 = vld [vmem:[#allocation2 + $0x78] sm:$0xff]  ;;  %v46_v1 = vld [vmem:[#allocation2 + $0x70] sm:$0xff]  ;;  %s150_s22 = smov [#allocation5]   ;;  %s80_s26 = sshll.u32 %s186_s3, 4  ;;  %s81_s26 = int_to_ptr.hbm [resolvable:$true] %s80_s26 }
   0x7   :  { %52 = vmatpush.msra.mxu0 %v47_v0  ;;  %v45_v2 = vld [vmem:[#allocation2 + $0x68] sm:$0xff]  ;;  %v44_v3 = vld [vmem:[#allocation2 + $0x60] sm:$0xff]  ;;  %v43_v4 = vld [vmem:[#allocation2 + $0x58] sm:$0xff]  ;;  %s78_s23 = sshll.u32 %s150_s22, 4  ;;  %s79_s23 = int_to_ptr.vmem [resolvable:$true] %s78_s23 }
   0x8   :  { %v42_v5 = vld [vmem:[#allocation2 + $0x50] sm:$0xff]  ;;  %v41_v6 = vld [vmem:[#allocation2 + $0x48] sm:$0xff]  ;;  %v40_v7 = vld [vmem:[#allocation2 + $0x40] sm:$0xff] }
   0x9   :  { %53 = vmatpush.msra.mxu0 %v46_v1  ;;  %v39_v8 = vld [vmem:[#allocation2 + $0x38] sm:$0xff]  ;;  %v38_v9 = vld [vmem:[#allocation2 + $0x30] sm:$0xff]  ;;  %v37_v10 = vld [vmem:[#allocation2 + $0x28] sm:$0xff] }
   0xa   :  { %v36_v11 = vld [vmem:[#allocation2 + $0x20] sm:$0xff]  ;;  %v35_v12 = vld [vmem:[#allocation2 + $0x18] sm:$0xff]  ;;  %v34_v13 = vld [vmem:[#allocation2 + $0x10] sm:$0xff] }
   0xb   :  { %54 = vmatpush.msra.mxu0 %v45_v2  ;;  %v33_v14 = vld [vmem:[#allocation2 + $0x8] sm:$0xff]  ;;  %v32_v15 = vld [vmem:[#allocation2] sm:$0xff] }
   0xc   :  { %v31_v16 = vld [vmem:[%s183_s0] sm:$0xff] }
   0xd   :  { %55 = vmatpush.msra.mxu0 %v44_v3  ;;  %v94_v17 = vld [vmem:[%s185_s2] ss:$0 sm:$0xff] }
   0xf   :  { %56 = vmatpush.msra.mxu0 %v43_v4 }
  0x11   :  { %57 = vmatpush.msra.mxu0 %v42_v5 }
  0x13   :  { %58 = vmatpush.msra.mxu0 %v41_v6 }
  0x15   :  { %59 = vmatpush.msra.mxu0 %v40_v7 }
  0x17   :  { %60 = vmatpush.msra.mxu0 %v39_v8 }
  0x19   :  { %61 = vmatpush.msra.mxu0 %v38_v9 }
  0x1b   :  { %62 = vmatpush.msra.mxu0 %v37_v10 }
  0x1d   :  { %63 = vmatpush.msra.mxu0 %v36_v11 }
  0x1f   :  { %64 = vmatpush.msra.mxu0 %v35_v12 }
  0x21   :  { %65 = vmatpush.msra.mxu0 %v34_v13 }
  0x23   :  { %66 = vmatpush.msra.mxu0 %v33_v14 }
  0x25   :  { %67 = vmatpush.msra.mxu0 %v32_v15 }
  0x26   :  { %68 = vmatmul.f32.vlgmr.msra.gmra.mxu0 %v31_v16 }
  0xa3   :  { %v69_v18 = vpop.f32.mrf.mxu0 }
  0xa4   :  { %v70_v19 = vadd.f32 %v94_v17, %v69_v18 }
  0xa6   :  { %72 = vst [vmem:[#allocation5] sm:$0xff] %v70_v19 }
  0xa7   :  { %83 = dma.vmem_to_hbm [thread:$0]  %s79_s23, 128, %s81_s26, [#allocation4]  }
  0xa8   :  { %145 = dma.done.wait [#allocation4], 128  }
  0xa9   :  { %146 = vsyncadd [#allocation4], 4294967168 }
  0xaa   :  { %88 = vsyncpa [#allocation3], 1 }
  0xab   :  { %89 = vsyncpa [#allocation4], 1 }

</bundles_post_ra>
